<compile_context>
chip_gen: v7x
topology: tpu7x:2x2x1
jax: 0.10.0
libtpu: 0.0.40
codegen_flags: <defaults>
</compile_context>

<pallas_src>
import math

import jax
import jax.numpy as jnp
from jax.experimental import pallas as pl
from jax.experimental.pallas import tpu as pltpu

_LANES = 128


def perceptron_kernel(x_ref, params_ref, o_ref):
    # x_ref:      (2, rb, 128) VMEM -- x0 = x_ref[0], x1 = x_ref[1], dense slabs
    # params_ref: (3,)         SMEM -- [w0, w1, b] scalars
    # o_ref:      (rb, 128)    VMEM -- dense output slab
    w0 = params_ref[0]
    w1 = params_ref[1]
    b = params_ref[2]

    x0 = x_ref[0].astype(jnp.float32)   # casts (if any) hide under the load
    x1 = x_ref[1].astype(jnp.float32)   # f32 compute: v5e VPU/EUP have no bf16

    # Unrolled 2-term dot product: pure VPU scalar-broadcast FMA.
    z = x0 * w0 + x1 * w1 + b
    # Sigmoid: exp on the EUP + one divide.  (pl.reciprocal(1+e, approx=True)
    # would keep both steps on the EUP but costs ~1e-4 accuracy; unnecessary,
    # this kernel is HBM-bandwidth-bound.)
    y = 1.0 / (1.0 + jnp.exp(-z))
    o_ref[...] = y.astype(o_ref.dtype)


def perceptron_forward_fm(x_fm, weight, bias, *, block_rows=4096,
                          out_dtype=jnp.float32):
    """Fast path. x_fm: (2, B) feature-major activations (rows contiguous).

    Returns sigmoid(w0*x0 + w1*x1 + b), shape (B, 1), dtype `out_dtype`
    (use jnp.bfloat16 to shave output HBM traffic if downstream tolerates it).
    """
    in_features, B = x_fm.shape
    out_features = weight.shape[0]
    # The kernel hard-codes the 2 -> 1 perceptron; guard against silent misuse.
    assert in_features == 2, "kernel is specialized to in_features == 2"
    assert out_features == 1 and weight.shape == (1, 2) and bias.shape == (1,)

    # Lane/sublane-dense 2-D view of each feature vector: (B,) -> (R, 128).
    R = pl.cdiv(B, _LANES)
    B_pad = R * _LANES
    if B_pad != B:
        # TODO(synk): only hit when B % 128 != 0; produce 128-aligned batches
        # upstream to keep this path copy-free (jnp.pad is a full HBM pass).
        x_fm = jnp.pad(x_fm, ((0, 0), (0, B_pad - B)))
    xs = x_fm.reshape(in_features, R, _LANES)      # free view (contiguous)

    # Row tile: whole array for small batches (single grid step); otherwise
    # 4096 rows * 128 lanes = 512K batch elems per step (~12 MiB double
    # buffered -> fits v5e's 16 MiB scoped VMEM; raise block_rows and
    # vmem_limit_bytes on v6e/v7x when sweeping for roofline).
    rb = R if R <= block_rows else block_rows
    grid = (pl.cdiv(R, rb),)

    # Pack [w0, w1, b] for the scalar (SMEM) path.
    params = jnp.concatenate(
        [weight.reshape(-1), bias.reshape(-1)]).astype(jnp.float32)   # (3,)

    out2d = pl.pallas_call(
        perceptron_kernel,
        out_shape=jax.ShapeDtypeStruct((R, _LANES), out_dtype),
        grid=grid,
        in_specs=[
            # (2, rb, 128): trailing two dims are (multiple of 8 or full dim,
            # 128) -> dense (8,128) tiling, fully packed vregs.
            pl.BlockSpec((in_features, rb, _LANES), lambda i: (0, i, 0)),
            # Whole 3-float parameter vector lives in SMEM.
            pl.BlockSpec(memory_space=pltpu.MemorySpace.SMEM),
        ],
        out_specs=pl.BlockSpec((rb, _LANES), lambda i: (i, 0)),
        compiler_params=pltpu.CompilerParams(
            dimension_semantics=("parallel",)),   # v7x: shard blocks over TCs
    )(xs, params)

    out = out2d.reshape(B_pad)
    if B_pad != B:
        out = out[:B]
    return out.reshape(B, 1)


def perceptron_forward(x, weight, bias, **kwargs):
    """PyTorch-layout adapter: x is (B, 2) as in the nn.Module.

    The x.T below is exactly the extra HBM pass the fast path avoids; on hot
    paths produce feature-major activations upstream and call
    `perceptron_forward_fm` directly (or fuse this epilogue into x's producer).
    """
    B, in_features = x.shape
    assert in_features == 2
    return perceptron_forward_fm(x.T, weight, bias, **kwargs)


if __name__ == "__main__":
    key = jax.random.PRNGKey(0)
    k_w, k_b, k_x1, k_x2 = jax.random.split(key, 4)

    in_features, out_features = 2, 1

    # Deterministic parameter init mimicking PyTorch nn.Linear's default
    # U(-1/sqrt(fan_in), 1/sqrt(fan_in)).
    bound = 1.0 / math.sqrt(in_features)
    weight = jax.random.uniform(
        k_w, (out_features, in_features), jnp.float32, -bound, bound)
    bias = jax.random.uniform(k_b, (out_features,), jnp.float32, -bound, bound)

    def reference(x_bf):                      # x_bf: (B, 2) PyTorch layout
        return jax.nn.sigmoid(x_bf @ weight.T + bias)

    # Case 1: feature-major fast path, 128-aligned batch (zero-copy layout).
    B1 = 256
    x_fm = jax.random.normal(k_x1, (in_features, B1), jnp.float32)
    out1 = jax.block_until_ready(perceptron_forward_fm(x_fm, weight, bias))
    ref1 = reference(x_fm.T)
    assert out1.shape == (B1, out_features)
    assert jnp.allclose(out1, ref1, atol=1e-5), float(jnp.max(jnp.abs(out1 - ref1)))

    # Case 2: tiny, ragged batch through the PyTorch-layout (B, 2) adapter.
    B2 = 8
    x_small = jax.random.normal(k_x2, (B2, in_features), jnp.float32)
    out2 = jax.block_until_ready(perceptron_forward(x_small, weight, bias))
    ref2 = reference(x_small)
    assert out2.shape == (B2, out_features)
    assert jnp.allclose(out2, ref2, atol=1e-5), float(jnp.max(jnp.abs(out2 - ref2)))

    print("KERNEL_OK")
</pallas_src>

<mosaic_0001>
module attributes {stable_mosaic.version = 11 : i64} {
  func.func @perceptron_kernel(%arg0: i32, %arg1: memref<2x2x128xf32, #tpu.memory_space<vmem>>, %arg2: memref<3xf32, #tpu.memory_space<smem>>, %arg3: memref<2x128xf32, #tpu.memory_space<vmem>>) attributes {dimension_semantics = [#tpu.dimension_semantics<parallel>], iteration_bounds = array<i64: 1>, scalar_prefetch = 0 : i64, scratch_operands = 0 : i64, tpu.core_type = #tpu.core_type<tc>, window_params = [{transform_indices = @transform_0, window_bounds = array<i64: 2, 2, 128>}, {transform_indices = @transform_1, window_bounds = array<i64: 3>}, {transform_indices = @transform_2, window_bounds = array<i64: 2, 128>}]} {
    %c0 = arith.constant 0 : index
    %0 = memref.load %arg2[%c0] : memref<3xf32, #tpu.memory_space<smem>>
    %c1 = arith.constant 1 : index
    %1 = memref.load %arg2[%c1] : memref<3xf32, #tpu.memory_space<smem>>
    %c2 = arith.constant 2 : index
    %2 = memref.load %arg2[%c2] : memref<3xf32, #tpu.memory_space<smem>>
    %c0_0 = arith.constant 0 : index
    %c0_1 = arith.constant 0 : index
    %c0_2 = arith.constant 0 : index
    %3 = vector.load %arg1[%c0_0, %c0_1, %c0_2] : memref<2x2x128xf32, #tpu.memory_space<vmem>>, vector<1x2x128xf32>
    %4 = vector.shape_cast %3 : vector<1x2x128xf32> to vector<2x128xf32>
    %c1_3 = arith.constant 1 : index
    %c0_4 = arith.constant 0 : index
    %c0_5 = arith.constant 0 : index
    %5 = vector.load %arg1[%c1_3, %c0_4, %c0_5] : memref<2x2x128xf32, #tpu.memory_space<vmem>>, vector<1x2x128xf32>
    %6 = vector.shape_cast %5 : vector<1x2x128xf32> to vector<2x128xf32>
    %7 = vector.broadcast %0 : f32 to vector<2x128xf32>
    %8 = arith.mulf %4, %7 : vector<2x128xf32>
    %9 = vector.broadcast %1 : f32 to vector<2x128xf32>
    %10 = arith.mulf %6, %9 : vector<2x128xf32>
    %11 = arith.addf %8, %10 : vector<2x128xf32>
    %12 = vector.broadcast %2 : f32 to vector<2x128xf32>
    %13 = arith.addf %11, %12 : vector<2x128xf32>
    %cst = arith.constant 0.000000e+00 : f32
    %14 = vector.broadcast %cst : f32 to vector<2x128xf32>
    %15 = arith.subf %14, %13 : vector<2x128xf32>
    %16 = math.exp %15 : vector<2x128xf32>
    %cst_6 = arith.constant 1.000000e+00 : f32
    %17 = vector.broadcast %cst_6 : f32 to vector<2x128xf32>
    %18 = arith.addf %17, %16 : vector<2x128xf32>
    %cst_7 = arith.constant 1.000000e+00 : f32
    %19 = vector.broadcast %cst_7 : f32 to vector<2x128xf32>
    %20 = arith.divf %19, %18 : vector<2x128xf32>
    %c0_8 = arith.constant 0 : index
    %c0_9 = arith.constant 0 : index
    %21 = vector.load %arg3[%c0_8, %c0_9] : memref<2x128xf32, #tpu.memory_space<vmem>>, vector<2x128xf32>
    tpu.vector_store %arg3[%c0_8, %c0_9], %20 {strides = array<i32>} : memref<2x128xf32, #tpu.memory_space<vmem>>, vector<2x128xf32>,
    return
  }
  func.func @transform_0(%arg0: i32) -> (i32, i32, i32) {
    %c0_i32 = arith.constant 0 : i32
    %c0_i32_0 = arith.constant 0 : i32
    %c0_i32_1 = arith.constant 0 : i32
    return %c0_i32, %arg0, %c0_i32_0 : i32, i32, i32
  }
  func.func @transform_1(%arg0: i32) -> i32 {
    %c0_i32 = arith.constant 0 : i32
    %c0_i32_0 = arith.constant 0 : i32
    return %c0_i32 : i32
  }
  func.func @transform_2(%arg0: i32) -> (i32, i32) {
    %c0_i32 = arith.constant 0 : i32
    %c0_i32_0 = arith.constant 0 : i32
    return %arg0, %c0_i32 : i32, i32
  }
}

</mosaic_0001>

<bundles_post_ra>
// kernel: tpu_custom_call.1
= control target key start
LH: loop header
LB: loop body
LE: loop exit
PB: predicated region body
PF: predicated region fallthrough
CT: control target
= control target key end

     0   :  { %7 = vsyncpa [#allocation3], 0  ;;  %s195_s0 = inlined_call_operand.hbm [shape: f32[2,2,128], index: 0, kind: input, shape index: {}]   ;;  %s196_s1 = inlined_call_operand.vmem [shape: f32[3], index: 1, kind: input, shape index: {}]   ;;  %s197_s2 = inlined_call_operand.hbm [shape: f32[2,128], index: 2, kind: output, shape index: {}]  }
   0x1   :  { %8 = vsyncpa [#allocation5], 0 }
   0x2   :  { %9 = vsyncpa [#allocation4], 0  ;;  %s148_s9 = smov [#allocation2]   ;;  %s28_s13 = sshll.u32 %s196_s1, 4  ;;  %s29_s13 = int_to_ptr.vmem [resolvable:$true] %s28_s13 }
   0x3   :  { %s15_s10 = sshll.u32 %s148_s9, 4  ;;  %s86_s16 = scalar_lea.hbm %s195_s0, 64  ;;  %s16_s10 = int_to_ptr.vmem [resolvable:$true] %s15_s10 }
   0x4   :  { %p87_p0 = scmp.ne.s32.totalorder %s195_s0, %s86_s16  ;;  %p90_p1 = scmp.lt.u32.totalorder %s86_s16, %s195_s0 }
   0x6   :  { %p92_p2 = pnand %p90_p1, %p87_p0 }
   0x8   :  { %95 = shalt.err (!%p92_p2)
}
   0x9   :  { %s96_s21 = scalar_lea.vmem %s16_s10, 64  ;;  %p101_p4 = scmp.lt.s32.totalorder %s16_s10, %s16_s10 }
   0xa   :  { %p97_p3 = scmp.ne.s32.totalorder %s16_s10, %s96_s21  ;;  %p102_p5 = scmp.lt.s32.totalorder %s96_s21, %s96_s21 }
   0xc   :  { %p103_p6 = por %p102_p5, %p101_p4 }
   0xe   :  { %p104_p7 = pnand %p103_p6, %p97_p3 }
  0x10   :  { %107 = shalt.err (!%p104_p7)
}
  0x11   :  { %s149_s1 = smov 32   ;;  %s150_s22 = smov 2  }
  0x12   :  { %21 = dma.hbm_to_vmem [thread:$0]  %s195_s0, 64, %s16_s10, [#allocation3], %s149_s1, %s149_s1, %s150_s22  }
  0x13   :  { %s108_s25 = scalar_lea.vmem %s29_s13, 16  ;;  %p113_p9 = scmp.lt.s32.totalorder %s29_s13, %s29_s13 }
  0x14   :  { %p109_p8 = scmp.ne.s32.totalorder %s29_s13, %s108_s25  ;;  %p114_p10 = scmp.lt.s32.totalorder %s108_s25, %s108_s25 }
  0x16   :  { %p115_p11 = por %p114_p10, %p113_p9 }
  0x18   :  { %p116_p12 = pnand %p115_p11, %p109_p8 }
  0x1a   :  { %119 = shalt.err (!%p116_p12)
}
  0x1b   :  { %s151_s26 = smov [#allocation6]  }
  0x1c   :  { %31 = dma.vmem_to_smem %s29_s13, 16, %s151_s26, [#allocation5]  }
  0x1d   :  { %142 = dma.done.wait [#allocation3], 64  }
  0x1e   :  { %143 = vsyncadd [#allocation3], 4294967232 }
  0x1f   :  { %144 = dma.done.wait [#allocation5], 16  }
  0x20   :  { %145 = vsyncadd [#allocation5], 4294967280 }
  0x21   :  { %38 = sfence }
  0x22   :  { %s39_s27 = sld [smem:[#allocation6]]  ;;  %s75_s28 = sld [smem:[#allocation6 + $0x1]]  ;;  %v42_v0 = vld [vmem:[#allocation2] sm:$0x3]  ;;  %v44_v1 = vld [vmem:[#allocation2 + $0x2] sm:$0x3] }
  0x23   :  { %s76_s29 = sld [smem:[#allocation6 + $0x2]]  ;;  %s152_s0 = smov [#allocation7]  }
  0x24   :  { %s65_s30 = sshll.u32 %s152_s0, 4  ;;  %s66_s30 = int_to_ptr.vmem [resolvable:$true] %s65_s30 }
  0x25   :  { %s120_s3 = scalar_lea.vmem %s66_s30, 32  ;;  %p125_p0 = scmp.lt.s32.totalorder %s66_s30, %s66_s30 }
  0x26   :  { %p121_p13 = scmp.ne.s32.totalorder %s66_s30, %s120_s3  ;;  %p126_p1 = scmp.lt.s32.totalorder %s120_s3, %s120_s3 }
  0x28   :  { %v45_v2 = vstv %s39_s27  ;;  %v47_v3 = vstv %s75_s28  ;;  %p127_p2 = por %p126_p1, %p125_p0 }
  0x29   :  { %v46_v4 = vmul.f32 %v45_v2, %v42_v0  ;;  %v48_v5 = vmul.f32 %v47_v3, %v44_v1  ;;  %v50_v6 = vstv %s76_s29 }
  0x2a   :  { %p128_p3 = pnand %p127_p2, %p121_p13 }
  0x2b   :  { %v49_v7 = vadd.f32 %v48_v5, %v46_v4 }
  0x2d   :  { %v51_v8 = vadd.f32 %v50_v6, %v49_v7 }
  0x2f   :  { %v52_v9 = vsub.f32 0.0, %v51_v8 }
  0x31   :  { %v53_v10 = vmul.f32 1.442695, %v52_v9 }
  0x33   :  { %82 = vpow2.f32 %v53_v10 }
  0x3d   :  { %v83_v11 = vpop.eup %82 }
  0x3e   :  { %v55_v12 = vadd.f32 1.0, %v83_v11 }
  0x40   :  { %84 = vrcp.f32 %v55_v12 }
  0x4a   :  { %v85_v13 = vpop.eup %84 }
  0x4b   :  { %58 = vst [vmem:[#allocation7] sm:$0x3] %v85_v13 }
  0x4c   :  { %131 = shalt.err (!%p128_p3)
}
  0x4d   :  { %s132_s6 = scalar_lea.hbm %s197_s2, 32 }
  0x4e   :  { %p133_p4 = scmp.ne.s32.totalorder %s197_s2, %s132_s6  ;;  %p136_p5 = scmp.lt.u32.totalorder %s132_s6, %s197_s2 }
  0x50   :  { %p138_p6 = pnand %p136_p5, %p133_p4 }
  0x52   :  { %141 = shalt.err (!%p138_p6)
}
  0x53   :  { %68 = dma.vmem_to_hbm [thread:$0]  %s66_s30, 32, %s197_s2, [#allocation4]  }
  0x54   :  { %146 = dma.done.wait [#allocation4], 32  }
  0x55   :  { %147 = vsyncadd [#allocation4], 4294967264 }
  0x56   :  { %72 = vsyncpa [#allocation3], 1 }
  0x57   :  { %73 = vsyncpa [#allocation4], 1 }
  0x58   :  { %74 = vsyncpa [#allocation5], 1 }

</bundles_post_ra>
